<compile_context>
chip_gen: v5e
topology: v5e:2x2
jax: 0.10.0
libtpu: 0.0.40
codegen_flags: <defaults>
</compile_context>

<pallas_src>
import functools

import jax
import jax.numpy as jnp
from jax.experimental import pallas as pl
from jax.experimental.pallas import tpu as pltpu


def _round_up(x, m):
    return ((x + m - 1) // m) * m


# -----------------------------------------------------------------------------
# Per-chip static configuration (trace-time Python constants)
# -----------------------------------------------------------------------------
def _chip_config():
    kind = ""
    try:
        kind = jax.devices()[0].device_kind.lower()
    except Exception:
        pass
    vmem_cap = None
    try:
        vmem_cap = int(pltpu.get_tpu_info().vmem_capacity_bytes)
    except Exception:
        vmem_cap = None

    is_v5e = ("v5 lite" in kind) or ("v5e" in kind) or ("v5lite" in kind)
    is_v7 = "v7" in kind
    if vmem_cap is None:
        vmem_cap = (64 << 20) if is_v7 else (128 << 20)

    # Scoped-VMEM limit requested from the compiler: ~100 MiB on v5e/v6e
    # (128 MiB physical), ~48 MiB on v7x (64 MiB physical per TensorCore).
    vmem_limit = min(vmem_cap - (16 << 20), (48 << 20) if is_v7 else (100 << 20))
    vmem_limit = max(vmem_limit, 16 << 20)
    # Tile-selection budget: leave slack below the scoped limit for compiler
    # internal scratch / spills.
    budget = vmem_limit - (4 << 20)
    # bf16 VPU/EUP exist on v6e/v7x only; keep f32 elementwise math on v5e.
    use_bf16_act = not is_v5e
    # v7x has 2 TensorCores per chip -> make sure the batch grid has >=2 steps.
    two_cores = is_v7
    return budget, vmem_limit, use_bf16_act, two_cores


# -----------------------------------------------------------------------------
# Batch-tile selection with full VMEM accounting
# -----------------------------------------------------------------------------
def _choose_batch_tile(b_pad, n_pad, p_pad, d_pad, kp, *, use_bf16_act,
                       budget_bytes, two_cores):
    """Largest TB (images per grid step, multiple of 8, dividing b_pad) whose
    resident + per-step VMEM footprint fits the per-chip budget."""
    # Resident weights/biases (single-buffered via pl.Buffered(1)).
    resident = (p_pad * d_pad * 2      # w_emb  bf16
                + d_pad * 4            # b_emb  f32
                + d_pad * kp * 2       # w_head bf16
                + kp * 4)              # b_head f32
    # Peak activation bytes per (token, feature) element: f32 matmul result
    # plus the bf16 GELU copy (or a possible f32 relayout copy on v5e).
    act_bytes = 6 if use_bf16_act else 8
    per_image = (n_pad * p_pad * 2 * 2       # bf16 patch tile, double-buffered
                 + n_pad * d_pad * act_bytes  # activation h (peak)
                 + d_pad * 4                  # pooled row (f32)
                 + kp * 4 * 2                 # logits out tile, double-buffered
                 + 128 * 4 * 2                # loss out tile, double-buffered
                 + 4 * 2)                     # labels tile
    avail = budget_bytes - resident

    tb_cap = b_pad
    if two_cores and b_pad >= 16:
        tb_cap = max(8, b_pad // 2)   # >=2 grid steps so both TCs get work

    best = 8
    tb = 8
    while tb <= tb_cap:
        if b_pad % tb == 0 and tb * per_image <= avail:
            best = tb
        tb += 8
    return best


# -----------------------------------------------------------------------------
# Fused forward kernel (one batch tile per grid step)
# -----------------------------------------------------------------------------
def _model_kernel(patches_ref,   # [TB*Np, Pp]  bf16  (streamed patch tile)
                  labels_ref,    # [TB, 1]      int32 (streamed labels)
                  w_emb_ref,     # [Pp, Dp]     bf16  (resident, Buffered(1))
                  b_emb_ref,     # [1, Dp]      f32   (resident)
                  w_head_ref,    # [Dp, Kp]     bf16  (resident)
                  b_head_ref,    # [1, Kp]      f32   (resident)
                  logits_ref,    # out: [TB, Kp]  f32
                  loss_ref,      # out: [TB, 128] f32 (per-sample NLL, lane-dense)
                  *, tokens_per_image, padded_tokens, num_classes, use_bf16_act):
    # Patch embedding as one 2-D MXU matmul: bf16 inputs, f32 accumulate.
    x = patches_ref[...]                                             # [TB*Np, Pp]
    h = jnp.dot(x, w_emb_ref[...],
                preferred_element_type=jnp.float32)                  # [TB*Np, Dp]
    h = h + b_emb_ref[...]                                           # bias broadcast
    if use_bf16_act:
        # bf16 VPU/EUP on v6e/v7x: halves elementwise cost + VMEM for h.
        h = h.astype(jnp.bfloat16)
    h = jax.nn.gelu(h, approximate=True)
    # TODO(synk): timm ViT uses exact (erf) GELU; tanh approximation used here.

    # Global average pool over the (sublane-aligned, padded) token axis,
    # accumulating in f32.  Padded zero-patch rows contribute gelu(bias) each,
    # which is subtracted analytically below.
    tbn, d = h.shape
    tb = tbn // padded_tokens
    h3 = h.reshape(tb, padded_tokens, d)
    pooled_sum = jnp.sum(h3, axis=1, dtype=jnp.float32)              # [TB, Dp]
    if padded_tokens != tokens_per_image:
        hb = b_emb_ref[...]
        if use_bf16_act:
            hb = hb.astype(jnp.bfloat16)
        pad_vec = jax.nn.gelu(hb, approximate=True).astype(jnp.float32)
        pooled_sum = pooled_sum - (padded_tokens - tokens_per_image) * pad_vec
    pooled = pooled_sum * (1.0 / tokens_per_image)                   # [TB, Dp] f32
    # TODO(synk): for very large TB*N tiles, stream embed+GELU+pool over
    # token-row chunks (inner fori_loop) so h never fully materializes; the
    # tile chooser already budgets h, so it is not needed at these sizes.

    # Classifier head: bf16 x bf16 -> f32 on the MXU (class dim lane-padded).
    logits = jnp.dot(pooled.astype(jnp.bfloat16), w_head_ref[...],
                     preferred_element_type=jnp.float32)             # [TB, Kp]
    logits = logits + b_head_ref[...]
    logits_ref[...] = logits

    # Cross entropy per sample; padded class columns masked out of the lse
    # (mask constant stays in f32 — do not move this math to bf16).
    col = jax.lax.broadcasted_iota(jnp.int32, logits.shape, 1)       # [TB, Kp]
    masked = jnp.where(col < num_classes, logits, jnp.float32(-1e30))
    m = jnp.max(masked, axis=-1, keepdims=True)                      # [TB, 1]
    lse = m + jnp.log(jnp.sum(jnp.exp(masked - m), axis=-1, keepdims=True))
    true_logit = jnp.sum(jnp.where(col == labels_ref[...], logits, 0.0),
                         axis=-1, keepdims=True)                     # [TB, 1]
    nll = lse - true_logit
    # Lane-dense store of the per-sample loss (avoids masked vst.msk writes).
    loss_ref[...] = jnp.broadcast_to(nll, loss_ref.shape)


# -----------------------------------------------------------------------------
# Wrapper: patchify + padding glue, pallas_call with batch-tiled grid
# -----------------------------------------------------------------------------
@functools.partial(jax.jit, static_argnames=('patch_size', 'num_classes'))
def timm_image_classification_forward(pixel_values, labels, params,
                                      patch_size, num_classes):
    """pixel_values: [B, C, H, W] float (NCHW); labels: [B] int."""
    w_emb, b_emb, w_head, b_head = (
        params['w_emb'], params['b_emb'], params['w_head'], params['b_head'])

    B, C, H, W = pixel_values.shape
    ps = patch_size
    nH, nW = H // ps, W // ps
    N = nH * nW
    P = C * ps * ps
    D = w_emb.shape[1]
    K = num_classes

    budget, vmem_limit, use_bf16_act, two_cores = _chip_config()

    # Lane / sublane padding of contraction, feature, class and token dims.
    P_pad = _round_up(P, 128)      # full MXU K passes
    D_pad = _round_up(D, 128)
    Kp = _round_up(K, 128)         # lane-dense class dim
    N_pad = _round_up(N, 8)        # sublane-aligned token axis (avoids relayout)
    B_pad = _round_up(B, 8)

    # Unfold NCHW image into flattened bf16 patch rows (halves HBM traffic of
    # the relayout and of the kernel's dominant input).
    # TODO(synk): on v5e confirm XLA fuses this cast+transpose+reshape into one
    # HBM pass; otherwise move patch extraction into the kernel grid.
    x = pixel_values.astype(jnp.bfloat16)
    x = x.reshape(B, C, nH, ps, nW, ps)
    x = jnp.transpose(x, (0, 2, 4, 1, 3, 5))            # [B, nH, nW, C, ps, ps]
    patches = x.reshape(B, N, P)
    patches = jnp.pad(patches, ((0, 0), (0, N_pad - N), (0, P_pad - P)))
    patches = patches.reshape(B * N_pad, P_pad)
    if B_pad != B:
        patches = jnp.pad(patches, ((0, (B_pad - B) * N_pad), (0, 0)))

    # int32 labels instead of a streamed f32 one-hot (drops B*Kp*4 HBM bytes).
    labels2d = labels.astype(jnp.int32).reshape(B, 1)
    if B_pad != B:
        labels2d = jnp.pad(labels2d, ((0, B_pad - B), (0, 0)))

    # Resident parameters: bf16 matmul operands, f32 biases, zero-padded.
    w_emb_b = jnp.pad(w_emb, ((0, P_pad - P), (0, D_pad - D))).astype(jnp.bfloat16)
    b_emb_r = jnp.pad(b_emb, ((0, D_pad - D),)).reshape(1, D_pad).astype(jnp.float32)
    w_head_b = jnp.pad(w_head, ((0, D_pad - D), (0, Kp - K))).astype(jnp.bfloat16)
    b_head_r = jnp.pad(b_head, ((0, Kp - K),)).reshape(1, Kp).astype(jnp.float32)

    TB = _choose_batch_tile(B_pad, N_pad, P_pad, D_pad, Kp,
                            use_bf16_act=use_bf16_act,
                            budget_bytes=budget, two_cores=two_cores)
    grid = (B_pad // TB,)

    kernel = functools.partial(_model_kernel,
                               tokens_per_image=N, padded_tokens=N_pad,
                               num_classes=K, use_bf16_act=use_bf16_act)

    flops = 2 * B_pad * N_pad * P_pad * D_pad + 2 * B_pad * D_pad * Kp
    bytes_accessed = (patches.size * 2 + labels2d.size * 4
                      + w_emb_b.size * 2 + b_emb_r.size * 4
                      + w_head_b.size * 2 + b_head_r.size * 4
                      + B_pad * Kp * 4 + B_pad * 128 * 4)

    logits_pad, losses = pl.pallas_call(
        kernel,
        out_shape=(
            jax.ShapeDtypeStruct((B_pad, Kp), jnp.float32),
            jax.ShapeDtypeStruct((B_pad, 128), jnp.float32),
        ),
        grid=grid,
        in_specs=[
            # Streamed (double-buffered) per-step inputs.
            pl.BlockSpec((TB * N_pad, P_pad), lambda i: (i, 0)),
            pl.BlockSpec((TB, 1), lambda i: (i, 0)),
            # Resident weights/biases: constant block index, single-buffered.
            pl.BlockSpec((P_pad, D_pad), lambda i: (0, 0),
                         pipeline_mode=pl.Buffered(1)),
            pl.BlockSpec((1, D_pad), lambda i: (0, 0),
                         pipeline_mode=pl.Buffered(1)),
            pl.BlockSpec((D_pad, Kp), lambda i: (0, 0),
                         pipeline_mode=pl.Buffered(1)),
            pl.BlockSpec((1, Kp), lambda i: (0, 0),
                         pipeline_mode=pl.Buffered(1)),
        ],
        out_specs=(
            pl.BlockSpec((TB, Kp), lambda i: (i, 0)),
            pl.BlockSpec((TB, 128), lambda i: (i, 0)),
        ),
        compiler_params=pltpu.CompilerParams(
            dimension_semantics=("parallel",),
            vmem_limit_bytes=vmem_limit),
        cost_estimate=pl.CostEstimate(
            flops=flops,
            transcendentals=B_pad * N_pad * D_pad,
            bytes_accessed=bytes_accessed),
    )(patches, labels2d, w_emb_b, b_emb_r, w_head_b, b_head_r)

    logits = logits_pad[:B, :K]
    loss = jnp.mean(losses[:B, 0])
    return loss, logits


def init_params(key, in_chans, patch_size, embed_dim, num_classes):
    """Deterministic synthetic parameters (no checkpoint loading)."""
    # TODO(synk): arbitrary pretrained timm backbones (resnets, full ViTs) are
    # not reproduced; a deterministic patch-embed classifier stands in.
    k1, k2, k3, k4 = jax.random.split(key, 4)
    P = in_chans * patch_size * patch_size
    w_emb = jax.random.normal(k1, (P, embed_dim), jnp.float32) * 0.02
    b_emb = jax.random.normal(k2, (embed_dim,), jnp.float32) * 0.02
    w_head = jax.random.normal(k3, (embed_dim, num_classes), jnp.float32) * 0.02
    b_head = jax.random.normal(k4, (num_classes,), jnp.float32) * 0.02
    return dict(w_emb=w_emb, b_emb=b_emb, w_head=w_head, b_head=b_head)


if __name__ == "__main__":
    # Small shapes consistent with the module's forward signature.
    B, C, H, W = 2, 4, 16, 16
    patch_size = 4
    embed_dim = 32
    num_classes = 10

    key = jax.random.PRNGKey(0)
    k_img, k_lbl, k_par = jax.random.split(key, 3)

    pixel_values = jax.random.normal(k_img, (B, C, H, W), jnp.float32)  # NCHW
    labels = jax.random.randint(k_lbl, (B,), 0, num_classes, jnp.int32)
    params = init_params(k_par, C, patch_size, embed_dim, num_classes)

    loss, logits = timm_image_classification_forward(
        pixel_values, labels, params, patch_size, num_classes)
    jax.block_until_ready((loss, logits))

    assert logits.shape == (B, num_classes)
    assert loss.shape == ()
    assert bool(jnp.isfinite(loss))
    print("KERNEL_OK")
</pallas_src>

<mosaic_0001>
module attributes {stable_mosaic.version = 11 : i64} {
  func.func @_model_kernel(%arg0: i32, %arg1: memref<128x128xbf16, #tpu.memory_space<vmem>>, %arg2: memref<8x1xi32, #tpu.memory_space<vmem>>, %arg3: memref<128x128xbf16, #tpu.memory_space<vmem>>, %arg4: memref<1x128xf32, #tpu.memory_space<vmem>>, %arg5: memref<128x128xbf16, #tpu.memory_space<vmem>>, %arg6: memref<1x128xf32, #tpu.memory_space<vmem>>, %arg7: memref<8x128xf32, #tpu.memory_space<vmem>>, %arg8: memref<8x128xf32, #tpu.memory_space<vmem>>) attributes {dimension_semantics = [#tpu.dimension_semantics<parallel>], iteration_bounds = array<i64: 1>, scalar_prefetch = 0 : i64, scratch_operands = 0 : i64, tpu.core_type = #tpu.core_type<tc>, window_params = [{transform_indices = @transform_0, window_bounds = array<i64: 128, 128>}, {transform_indices = @transform_1, window_bounds = array<i64: 8, 1>}, {pipeline_mode = #tpu.pipeline_mode<synchronous>, transform_indices = @transform_2, window_bounds = array<i64: 128, 128>}, {pipeline_mode = #tpu.pipeline_mode<synchronous>, transform_indices = @transform_3, window_bounds = array<i64: 1, 128>}, {pipeline_mode = #tpu.pipeline_mode<synchronous>, transform_indices = @transform_4, window_bounds = array<i64: 128, 128>}, {pipeline_mode = #tpu.pipeline_mode<synchronous>, transform_indices = @transform_5, window_bounds = array<i64: 1, 128>}, {transform_indices = @transform_6, window_bounds = array<i64: 8, 128>}, {transform_indices = @transform_7, window_bounds = array<i64: 8, 128>}]} {
    %c0 = arith.constant 0 : index
    %c0_0 = arith.constant 0 : index
    %0 = vector.load %arg1[%c0, %c0_0] : memref<128x128xbf16, #tpu.memory_space<vmem>>, vector<128x128xbf16>
    %c0_1 = arith.constant 0 : index
    %c0_2 = arith.constant 0 : index
    %1 = vector.load %arg3[%c0_1, %c0_2] : memref<128x128xbf16, #tpu.memory_space<vmem>>, vector<128x128xbf16>
    %cst = arith.constant dense<0.000000e+00> : vector<128x128xf32>
    %2 = tpu.matmul %0, %1, %cst {dimension_numbers = #tpu.dot_dimension_numbers<[1], [0], [0], [1], [0, 0, 1, 1], [], []>} : vector<128x128xbf16>, vector<128x128xbf16>, vector<128x128xf32> -> vector<128x128xf32>
    %c0_3 = arith.constant 0 : index
    %c0_4 = arith.constant 0 : index
    %3 = vector.load %arg4[%c0_3, %c0_4] : memref<1x128xf32, #tpu.memory_space<vmem>>, vector<1x128xf32>
    %4 = vector.broadcast %3 : vector<1x128xf32> to vector<128x128xf32>
    %5 = arith.addf %2, %4 : vector<128x128xf32>
    %6 = arith.truncf %5 : vector<128x128xf32> to vector<128x128xbf16>
    %7 = arith.mulf %6, %6 : vector<128x128xbf16>
    %8 = arith.mulf %6, %7 : vector<128x128xbf16>
    %cst_5 = arith.constant 4.467770e-02 : bf16
    %9 = vector.broadcast %cst_5 : bf16 to vector<128x128xbf16>
    %10 = arith.mulf %9, %8 : vector<128x128xbf16>
    %11 = arith.addf %6, %10 : vector<128x128xbf16>
    %cst_6 = arith.constant 7.968750e-01 : bf16
    %12 = vector.broadcast %cst_6 : bf16 to vector<128x128xbf16>
    %13 = arith.mulf %12, %11 : vector<128x128xbf16>
    %14 = math.tanh %13 : vector<128x128xbf16>
    %cst_7 = arith.constant 1.000000e+00 : bf16
    %15 = vector.broadcast %cst_7 : bf16 to vector<128x128xbf16>
    %16 = arith.addf %15, %14 : vector<128x128xbf16>
    %cst_8 = arith.constant 5.000000e-01 : bf16
    %17 = vector.broadcast %cst_8 : bf16 to vector<128x128xbf16>
    %18 = arith.mulf %17, %16 : vector<128x128xbf16>
    %19 = arith.mulf %6, %18 : vector<128x128xbf16>
    %20 = vector.shape_cast %19 : vector<128x128xbf16> to vector<8x16x128xbf16>
    %21 = arith.extf %20 : vector<8x16x128xbf16> to vector<8x16x128xf32>
    %cst_9 = arith.constant dense<0.000000e+00> : vector<8x128xf32>
    %22 = vector.multi_reduction <add>, %21, %cst_9 [1] : vector<8x16x128xf32> to vector<8x128xf32>
    %cst_10 = arith.constant 6.250000e-02 : f32
    %23 = vector.broadcast %cst_10 : f32 to vector<8x128xf32>
    %24 = arith.mulf %22, %23 : vector<8x128xf32>
    %25 = arith.truncf %24 : vector<8x128xf32> to vector<8x128xbf16>
    %c0_11 = arith.constant 0 : index
    %c0_12 = arith.constant 0 : index
    %26 = vector.load %arg5[%c0_11, %c0_12] : memref<128x128xbf16, #tpu.memory_space<vmem>>, vector<128x128xbf16>
    %cst_13 = arith.constant dense<0.000000e+00> : vector<8x128xf32>
    %27 = tpu.matmul %25, %26, %cst_13 {dimension_numbers = #tpu.dot_dimension_numbers<[1], [0], [0], [1], [0, 0, 1, 1], [], []>} : vector<8x128xbf16>, vector<128x128xbf16>, vector<8x128xf32> -> vector<8x128xf32>
    %c0_14 = arith.constant 0 : index
    %c0_15 = arith.constant 0 : index
    %28 = vector.load %arg6[%c0_14, %c0_15] : memref<1x128xf32, #tpu.memory_space<vmem>>, vector<1x128xf32>
    %29 = vector.broadcast %28 : vector<1x128xf32> to vector<8x128xf32>
    %30 = arith.addf %27, %29 : vector<8x128xf32>
    %c0_16 = arith.constant 0 : index
    %c0_17 = arith.constant 0 : index
    %31 = vector.load %arg7[%c0_16, %c0_17] : memref<8x128xf32, #tpu.memory_space<vmem>>, vector<8x128xf32>
    tpu.vector_store %arg7[%c0_16, %c0_17], %30 {strides = array<i32>} : memref<8x128xf32, #tpu.memory_space<vmem>>, vector<8x128xf32>,
    %32 = tpu.iota {dimensions = array<i32: 1>} : vector<8x128xi32>
    %c10_i32 = arith.constant 10 : i32
    %33 = vector.broadcast %c10_i32 : i32 to vector<8x128xi32>
    %34 = arith.cmpi slt, %32, %33 : vector<8x128xi32>
    %cst_18 = arith.constant -1.000000e+30 : f32
    %35 = vector.broadcast %cst_18 : f32 to vector<8x128xf32>
    %36 = arith.select %34, %30, %35 : vector<8x128xi1>, vector<8x128xf32>
    %cst_19 = arith.constant dense<0xFF800000> : vector<8xf32>
    %37 = vector.multi_reduction <maximumf>, %36, %cst_19 [1] : vector<8x128xf32> to vector<8xf32>
    %38 = vector.shape_cast %37 : vector<8xf32> to vector<8x1xf32>
    %39 = vector.broadcast %38 : vector<8x1xf32> to vector<8x128xf32>
    %40 = arith.subf %36, %39 : vector<8x128xf32>
    %41 = math.exp %40 : vector<8x128xf32>
    %cst_20 = arith.constant dense<0.000000e+00> : vector<8xf32>
    %42 = vector.multi_reduction <add>, %41, %cst_20 [1] : vector<8x128xf32> to vector<8xf32>
    %43 = vector.shape_cast %42 : vector<8xf32> to vector<8x1xf32>
    %44 = math.log %43 : vector<8x1xf32>
    %45 = arith.addf %38, %44 : vector<8x1xf32>
    %c0_21 = arith.constant 0 : index
    %c0_22 = arith.constant 0 : index
    %46 = vector.load %arg2[%c0_21, %c0_22] : memref<8x1xi32, #tpu.memory_space<vmem>>, vector<8x1xi32>
    %47 = vector.broadcast %46 : vector<8x1xi32> to vector<8x128xi32>
    %48 = arith.cmpi eq, %32, %47 : vector<8x128xi32>
    %cst_23 = arith.constant 0.000000e+00 : f32
    %49 = vector.broadcast %cst_23 : f32 to vector<8x128xf32>
    %50 = arith.select %48, %30, %49 : vector<8x128xi1>, vector<8x128xf32>
    %cst_24 = arith.constant dense<0.000000e+00> : vector<8xf32>
    %51 = vector.multi_reduction <add>, %50, %cst_24 [1] : vector<8x128xf32> to vector<8xf32>
    %52 = vector.shape_cast %51 : vector<8xf32> to vector<8x1xf32>
    %53 = arith.subf %45, %52 : vector<8x1xf32>
    %54 = vector.shape_cast %53 : vector<8x1xf32> to vector<8x1xf32>
    %55 = vector.broadcast %54 : vector<8x1xf32> to vector<8x128xf32>
    %c0_25 = arith.constant 0 : index
    %c0_26 = arith.constant 0 : index
    %56 = vector.load %arg8[%c0_25, %c0_26] : memref<8x128xf32, #tpu.memory_space<vmem>>, vector<8x128xf32>
    tpu.vector_store %arg8[%c0_25, %c0_26], %55 {strides = array<i32>} : memref<8x128xf32, #tpu.memory_space<vmem>>, vector<8x128xf32>,
    return
  }
  func.func @transform_0(%arg0: i32) -> (i32, i32) {
    %c0_i32 = arith.constant 0 : i32
    %c0_i32_0 = arith.constant 0 : i32
    return %arg0, %c0_i32 : i32, i32
  }
  func.func @transform_1(%arg0: i32) -> (i32, i32) {
    %c0_i32 = arith.constant 0 : i32
    %c0_i32_0 = arith.constant 0 : i32
    return %arg0, %c0_i32 : i32, i32
  }
  func.func @transform_2(%arg0: i32) -> (i32, i32) {
    %c0_i32 = arith.constant 0 : i32
    %c0_i32_0 = arith.constant 0 : i32
    %c0_i32_1 = arith.constant 0 : i32
    return %c0_i32, %c0_i32_0 : i32, i32
  }
  func.func @transform_3(%arg0: i32) -> (i32, i32) {
    %c0_i32 = arith.constant 0 : i32
    %c0_i32_0 = arith.constant 0 : i32
    %c0_i32_1 = arith.constant 0 : i32
    return %c0_i32, %c0_i32_0 : i32, i32
  }
  func.func @transform_4(%arg0: i32) -> (i32, i32) {
    %c0_i32 = arith.constant 0 : i32
    %c0_i32_0 = arith.constant 0 : i32
    %c0_i32_1 = arith.constant 0 : i32
    return %c0_i32, %c0_i32_0 : i32, i32
  }
  func.func @transform_5(%arg0: i32) -> (i32, i32) {
    %c0_i32 = arith.constant 0 : i32
    %c0_i32_0 = arith.constant 0 : i32
    %c0_i32_1 = arith.constant 0 : i32
    return %c0_i32, %c0_i32_0 : i32, i32
  }
  func.func @transform_6(%arg0: i32) -> (i32, i32) {
    %c0_i32 = arith.constant 0 : i32
    %c0_i32_0 = arith.constant 0 : i32
    return %arg0, %c0_i32 : i32, i32
  }
  func.func @transform_7(%arg0: i32) -> (i32, i32) {
    %c0_i32 = arith.constant 0 : i32
    %c0_i32_0 = arith.constant 0 : i32
    return %arg0, %c0_i32 : i32, i32
  }
}

</mosaic_0001>

<bundles_post_ra>
// kernel: timm_image_classification_forward.1
= control target key start
LH: loop header
LB: loop body
LE: loop exit
PB: predicated region body
PF: predicated region fallthrough
CT: control target
= control target key end

     0   :  { %vm778_vm0 = vcmask 1041409   ;;  %vm780_vm1 = vcmask 1042434   ;;  %vm782_vm2 = vcmask 1043459   ;;  %vm784_vm3 = vcmask 1044484   ;;  %s1344_s2 = inlined_call_operand.vmem [shape: bf16[128,128], index: 2, kind: input, shape index: {}]   ;;  %s1345_s3 = inlined_call_operand.vmem [shape: f32[1,128], index: 3, kind: input, shape index: {}]   ;;  %s1346_s0 = inlined_call_operand.vmem [shape: bf16[128,128], index: 0, kind: input, shape index: {}]   ;;  %s1347_s5 = inlined_call_operand.vmem [shape: f32[1,128], index: 5, kind: input, shape index: {}]   ;;  %s1348_s4 = inlined_call_operand.vmem [shape: bf16[128,128], index: 4, kind: input, shape index: {}]   ;;  %s1349_s6 = inlined_call_operand.vmem [shape: f32[8,128], index: 6, kind: output, shape index: {0}]   ;;  %s1350_s1 = inlined_call_operand.vmem [shape: s32[8,1], index: 1, kind: input, shape index: {}]   ;;  %s1351_s7 = inlined_call_operand.vmem [shape: f32[8,128], index: 7, kind: output, shape index: {1}]  }
   0x1   :  { %v999_v0 = vld [vmem:[%s1344_s2 + $0x38] sm:$0xff]  ;;  %v998_v1 = vld [vmem:[%s1344_s2 + $0x30] sm:$0xff]  ;;  %v997_v2 = vld [vmem:[%s1344_s2 + $0x28] sm:$0xff]  ;;  %vm786_vm4 = vcmask 1045509   ;;  %vm788_vm5 = vcmask 1046534   ;;  %vm790_vm6 = vcmask 1047559  }
   0x2   :  { %157 = vmatpush.bf16.msra.mxu0 %v999_v0  ;;  %1008 = vmatpush.bf16.msra.mxu2 %v999_v0  ;;  %v996_v3 = vld [vmem:[%s1344_s2 + $0x20] sm:$0xff]  ;;  %v995_v4 = vld [vmem:[%s1344_s2 + $0x18] sm:$0xff]  ;;  %v994_v5 = vld [vmem:[%s1344_s2 + $0x10] sm:$0xff] }
   0x3   :  { %1009 = vmatpush.bf16.msra.mxu3 %v999_v0  ;;  %v993_v6 = vld [vmem:[%s1344_s2 + $0x8] sm:$0xff]  ;;  %v992_v7 = vld [vmem:[%s1344_s2] sm:$0xff]  ;;  %v986_v9 = vld [vmem:[%s1346_s0 + $0x10] sm:$0xff] }
   0x4   :  { %v984_v8 = vld [vmem:[%s1346_s0] sm:$0xff]  ;;  %v989_v10 = vld [vmem:[%s1346_s0 + $0x28] sm:$0xff]  ;;  %v987_v12 = vld [vmem:[%s1346_s0 + $0x18] sm:$0xff] }
   0x5   :  { %v985_v11 = vld [vmem:[%s1346_s0 + $0x8] sm:$0xff]  ;;  %v990_v13 = vld [vmem:[%s1346_s0 + $0x30] sm:$0xff]  ;;  %v988_v14 = vld [vmem:[%s1346_s0 + $0x20] sm:$0xff] }
   0x6   :  { %158 = vmatpush.bf16.msra.mxu0 %v998_v1  ;;  %1010 = vmatpush.bf16.msra.mxu2 %v998_v1  ;;  %v991_v15 = vld [vmem:[%s1346_s0 + $0x38] sm:$0xff]  ;;  %v1156_v16 = vld [vmem:[%s1345_s3] ss:$0 sm:$0xff] }
   0x7   :  { %1011 = vmatpush.bf16.msra.mxu3 %v998_v1 }
   0xa   :  { %159 = vmatpush.bf16.msra.mxu0 %v997_v2  ;;  %1012 = vmatpush.bf16.msra.mxu2 %v997_v2 }
   0xb   :  { %1013 = vmatpush.bf16.msra.mxu3 %v997_v2 }
   0xe   :  { %160 = vmatpush.bf16.msra.mxu0 %v996_v3  ;;  %1014 = vmatpush.bf16.msra.mxu2 %v996_v3 }
   0xf   :  { %1015 = vmatpush.bf16.msra.mxu3 %v996_v3 }
  0x12   :  { %161 = vmatpush.bf16.msra.mxu0 %v995_v4  ;;  %1016 = vmatpush.bf16.msra.mxu2 %v995_v4 }
  0x13   :  { %1017 = vmatpush.bf16.msra.mxu3 %v995_v4 }
  0x16   :  { %162 = vmatpush.bf16.msra.mxu0 %v994_v5  ;;  %1018 = vmatpush.bf16.msra.mxu2 %v994_v5 }
  0x17   :  { %1019 = vmatpush.bf16.msra.mxu3 %v994_v5 }
  0x1a   :  { %163 = vmatpush.bf16.msra.mxu0 %v993_v6  ;;  %1020 = vmatpush.bf16.msra.mxu2 %v993_v6 }
  0x1b   :  { %1021 = vmatpush.bf16.msra.mxu3 %v993_v6 }
  0x1e   :  { %164 = vmatpush.bf16.msra.mxu0 %v992_v7  ;;  %1022 = vmatpush.bf16.msra.mxu2 %v992_v7 }
  0x1f   :  { %1023 = vmatpush.bf16.msra.mxu3 %v992_v7 }
  0x21   :  { %165 = vmatmul.bf16.vlgmr.msra.gmra.mxu0 %v984_v8  ;;  %175 = vmatmul.bf16.vlgmr.msra.gmra.mxu2 %v986_v9 }
  0x22   :  { %190 = vmatmul.bf16.vlgmr.msra.gmra.mxu3 %v989_v10 }
  0x31   :  { %170 = vmatmul.bf16.gmra.mxu0 %v985_v11  ;;  %180 = vmatmul.bf16.gmra.mxu2 %v987_v12 }
  0x32   :  { %195 = vmatmul.bf16.gmra.mxu3 %v990_v13 }
  0x41   :  { %185 = vmatmul.bf16.gmra.mxu2 %v988_v14 }
  0x42   :  { %200 = vmatmul.bf16.gmra.mxu3 %v991_v15 }
  0x9e   :  { %v166_v17 = vpop.f32.mrf.mxu0 }
  0x9f   :  { %v167_v18 = vadd.f32 %v1156_v16, %v166_v17 }
  0xa1   :  { %v206_v19 = vpack.c.bf16 %v167_v18, %v167_v18 }
  0xa3   :  { %v1159_v20 = vunpack.c.l.bf16 %v206_v19 }
  0xa4   :  { %v176_v21 = vpop.f32.mrf.mxu2 }
  0xa5   :  { %v238_v22 = vmul.f32 %v1159_v20, %v1159_v20  ;;  %v177_v23 = vadd.f32 %v1156_v16, %v176_v21  ;;  %v191_v24 = vpop.f32.mrf.mxu3 }
  0xa6   :  { %v192_v25 = vadd.f32 %v1156_v16, %v191_v24  ;;  %v168_v26 = vpop.f32.mrf.mxu0 }
  0xa7   :  { %v254_v27 = vpack.c.bf16 %v238_v22, %v238_v22  ;;  %v210_v28 = vpack.c.bf16 %v177_v23, %v177_v23  ;;  %v169_v29 = vadd.f32 %v1156_v16, %v168_v26 }
  0xa8   :  { %v216_v30 = vpack.c.bf16 %v192_v25, %v192_v25 }
  0xa9   :  { %v270_v31 = vunpack.c.l.bf16 %v254_v27  ;;  %v1166_v32 = vunpack.c.l.bf16 %v210_v28  ;;  %v207_v33 = vpack.c.bf16 %v169_v29, %v169_v29 }
  0xaa   :  { %v1168_v34 = vunpack.c.l.bf16 %v216_v30 }
  0xab   :  { %v286_v35 = vmul.f32 %v270_v31, %v1159_v20  ;;  %v242_v36 = vmul.f32 %v1166_v32, %v1166_v32  ;;  %v1173_v37 = vunpack.c.l.bf16 %v207_v33 }
  0xac   :  { %v248_v38 = vmul.f32 %v1168_v34, %v1168_v34  ;;  %v178_v39 = vpop.f32.mrf.mxu2 }
  0xad   :  { %v302_v40 = vpack.c.bf16 %v286_v35, %v286_v35  ;;  %v258_v41 = vpack.c.bf16 %v242_v36, %v242_v36  ;;  %v239_v42 = vmul.f32 %v1173_v37, %v1173_v37  ;;  %v179_v43 = vadd.f32 %v1156_v16, %v178_v39  ;;  %v193_v44 = vpop.f32.mrf.mxu3 }
  0xae   :  { %v264_v45 = vpack.c.bf16 %v248_v38, %v248_v38  ;;  %v194_v46 = vadd.f32 %v1156_v16, %v193_v44  ;;  %v171_v47 = vpop.f32.mrf.mxu0 }
  0xaf   :  { %v318_v48 = vunpack.c.l.bf16 %v302_v40  ;;  %v274_v49 = vunpack.c.l.bf16 %v258_v41  ;;  %v255_v50 = vpack.c.bf16 %v239_v42, %v239_v42  ;;  %v211_v51 = vpack.c.bf16 %v179_v43, %v179_v43 }
  0xb0   :  { %v280_v52 = vunpack.c.l.bf16 %v264_v45  ;;  %v217_v53 = vpack.c.bf16 %v194_v46, %v194_v46  ;;  %v172_v54 = vadd.f32 %v1156_v16, %v171_v47 }
  0xb1   :  { %v334_v55 = vmul.f32 0.044677734, %v318_v48  ;;  %v290_v56 = vmul.f32 %v274_v49, %v1166_v32  ;;  %v271_v57 = vunpack.c.l.bf16 %v255_v50  ;;  %v1183_v58 = vunpack.c.l.bf16 %v211_v51 }
  0xb2   :  { %v296_v59 = vmul.f32 %v280_v52, %v1168_v34  ;;  %v1186_v60 = vunpack.c.l.bf16 %v217_v53  ;;  %v208_v61 = vpack.c.bf16 %v172_v54, %v172_v54 }
  0xb3   :  { %v350_v62 = vpack.c.bf16 %v334_v55, %v334_v55  ;;  %v306_v63 = vpack.c.bf16 %v290_v56, %v290_v56  ;;  %v287_v0 = vmul.f32 %v271_v57, %v1173_v37  ;;  %v243_v1 = vmul.f32 %v1183_v58, %v1183_v58 }
  0xb4   :  { %v312_v2 = vpack.c.bf16 %v296_v59, %v296_v59  ;;  %v249_v3 = vmul.f32 %v1186_v60, %v1186_v60  ;;  %v1193_v4 = vunpack.c.l.bf16 %v208_v61  ;;  %v181_v5 = vpop.f32.mrf.mxu2 }
  0xb5   :  { %v366_v6 = vunpack.c.l.bf16 %v350_v62  ;;  %v322_v7 = vunpack.c.l.bf16 %v306_v63  ;;  %v303_v8 = vpack.c.bf16 %v287_v0, %v287_v0  ;;  %v259_v9 = vpack.c.bf16 %v243_v1, %v243_v1 }
  0xb6   :  { %v328_v10 = vunpack.c.l.bf16 %v312_v2  ;;  %v265_v11 = vpack.c.bf16 %v249_v3, %v249_v3  ;;  %v240_v12 = vmul.f32 %v1193_v4, %v1193_v4  ;;  %v182_v13 = vadd.f32 %v1156_v16, %v181_v5 }
  0xb7   :  { %v382_v14 = vadd.f32 %v366_v6, %v1159_v20  ;;  %v338_v15 = vmul.f32 0.044677734, %v322_v7  ;;  %v319_v17 = vunpack.c.l.bf16 %v303_v8  ;;  %v275_v18 = vunpack.c.l.bf16 %v259_v9  ;;  %v196_v6 = vpop.f32.mrf.mxu3 }
  0xb8   :  { %v344_v19 = vmul.f32 0.044677734, %v328_v10  ;;  %v281_v21 = vunpack.c.l.bf16 %v265_v11  ;;  %v256_v22 = vpack.c.bf16 %v240_v12, %v240_v12  ;;  %v212_v23 = vpack.c.bf16 %v182_v13, %v182_v13 }
  0xb9   :  { %v398_v24 = vpack.c.bf16 %v382_v14, %v382_v14  ;;  %v354_v25 = vpack.c.bf16 %v338_v15, %v338_v15  ;;  %v335_v26 = vmul.f32 0.044677734, %v319_v17  ;;  %v291_v27 = vmul.f32 %v275_v18, %v1183_v58 }
  0xba   :  { %v360_v28 = vpack.c.bf16 %v344_v19, %v344_v19  ;;  %v297_v29 = vmul.f32 %v281_v21, %v1186_v60  ;;  %v272_v30 = vunpack.c.l.bf16 %v256_v22  ;;  %v1201_v31 = vunpack.c.l.bf16 %v212_v23 }
  0xbb   :  { %v414_v33 = vunpack.c.l.bf16 %v398_v24  ;;  %v370_v35 = vunpack.c.l.bf16 %v354_v25  ;;  %v351_v36 = vpack.c.bf16 %v335_v26, %v335_v26  ;;  %v307_v38 = vpack.c.bf16 %v291_v27, %v291_v27 }
  0xbc   :  { %v376_v39 = vunpack.c.l.bf16 %v360_v28  ;;  %v313_v40 = vpack.c.bf16 %v297_v29, %v297_v29  ;;  %v288_v41 = vmul.f32 %v272_v30, %v1193_v4  ;;  %v244_v42 = vmul.f32 %v1201_v31, %v1201_v31 }
  0xbd   :  { %v430_v43 = vmul.f32 0.796875, %v414_v33  ;;  %v386_v44 = vadd.f32 %v370_v35, %v1166_v32  ;;  %v367_v45 = vunpack.c.l.bf16 %v351_v36  ;;  %v323_v46 = vunpack.c.l.bf16 %v307_v38 }
  0xbe   :  { %v392_v47 = vadd.f32 %v376_v39, %v1168_v34  ;;  %v329_v48 = vunpack.c.l.bf16 %v313_v40  ;;  %v304_v49 = vpack.c.bf16 %v288_v41, %v288_v41  ;;  %v260_v50 = vpack.c.bf16 %v244_v42, %v244_v42 }
  0xbf   :  { %v446_v51 = vpack.c.bf16 %v430_v43, %v430_v43  ;;  %v402_v52 = vpack.c.bf16 %v386_v44, %v386_v44  ;;  %v383_v53 = vadd.f32 %v367_v45, %v1173_v37  ;;  %v339_v54 = vmul.f32 0.044677734, %v323_v46  ;;  %v173_v46 = vpop.f32.mrf.mxu0 }
  0xc0   :  { %v408_v55 = vpack.c.bf16 %v392_v47, %v392_v47  ;;  %v345_v56 = vmul.f32 0.044677734, %v329_v48  ;;  %v320_v57 = vunpack.c.l.bf16 %v304_v49  ;;  %v276_v59 = vunpack.c.l.bf16 %v260_v50 }
  0xc1   :  { %v462_v61 = vunpack.c.l.bf16 %v446_v51  ;;  %v418_v62 = vunpack.c.l.bf16 %v402_v52  ;;  %v399_v63 = vpack.c.bf16 %v383_v53, %v383_v53  ;;  %v355_v0 = vpack.c.bf16 %v339_v54, %v339_v54 }
  0xc2   :  { %v424_v1 = vunpack.c.l.bf16 %v408_v55  ;;  %v361_v2 = vpack.c.bf16 %v345_v56, %v345_v56  ;;  %v336_v3 = vmul.f32 0.044677734, %v320_v57  ;;  %v292_v5 = vmul.f32 %v276_v59, %v1201_v31 }
  0xc3   :  { %1028 = vtanh.f32 %v462_v61  ;;  %v434_v7 = vmul.f32 0.796875, %v418_v62  ;;  %v415_v8 = vunpack.c.l.bf16 %v399_v63  ;;  %v371_v9 = vunpack.c.l.bf16 %v355_v0 }
  0xc4   :  { %v440_v10 = vmul.f32 0.796875, %v424_v1  ;;  %v377_v11 = vunpack.c.l.bf16 %v361_v2  ;;  %v308_v12 = vpack.c.bf16 %v292_v5, %v292_v5  ;;  %v197_v17 = vadd.f32 %v1156_v16, %v196_v6 }
  0xc5   :  { %v450_v13 = vpack.c.bf16 %v434_v7, %v434_v7  ;;  %v431_v14 = vmul.f32 0.796875, %v415_v8  ;;  %v387_v15 = vadd.f32 %v371_v9, %v1183_v58  ;;  %v352_v22 = vpack.c.bf16 %v336_v3, %v336_v3  ;;  %v183_v8 = vpop.f32.mrf.mxu2 }
  0xc6   :  { %v393_v18 = vadd.f32 %v377_v11, %v1186_v60  ;;  %v218_v23 = vpack.c.bf16 %v197_v17, %v197_v17  ;;  %v456_v24 = vpack.c.bf16 %v440_v10, %v440_v10  ;;  %v324_v28 = vunpack.c.l.bf16 %v308_v12 }
  0xc7   :  { %v447_v19 = vpack.c.bf16 %v431_v14, %v431_v14  ;;  %v403_v21 = vpack.c.bf16 %v387_v15, %v387_v15  ;;  %v466_v26 = vunpack.c.l.bf16 %v450_v13  ;;  %v368_v35 = vunpack.c.l.bf16 %v352_v22 }
  0xc8   :  { %v409_v27 = vpack.c.bf16 %v393_v18, %v393_v18  ;;  %v1213_v29 = vunpack.c.l.bf16 %v218_v23  ;;  %v472_v39 = vunpack.c.l.bf16 %v456_v24  ;;  %v340_v41 = vmul.f32 0.044677734, %v324_v28 }
  0xc9   :  { %v1029_v25 = vpop.eup %1028  ;;  %v463_v30 = vunpack.c.l.bf16 %v447_v19  ;;  %v419_v33 = vunpack.c.l.bf16 %v403_v21  ;;  %1030 = vtanh.f32 %v466_v26  ;;  %v384_v44 = vadd.f32 %v368_v35, %v1193_v4 }
  0xca   :  { %v250_v36 = vmul.f32 %v1213_v29, %v1213_v29  ;;  %v494_v38 = vpack.c.bf16 %v1029_v25, %v1029_v25  ;;  %v425_v40 = vunpack.c.l.bf16 %v409_v27  ;;  %v356_v49 = vpack.c.bf16 %v340_v41, %v340_v41 }
  0xcb   :  { %1032 = vtanh.f32 %v463_v30  ;;  %v435_v43 = vmul.f32 0.796875, %v419_v33  ;;  %v174_v51 = vadd.f32 %v1156_v16, %v173_v46  ;;  %v400_v54 = vpack.c.bf16 %v384_v44, %v384_v44 }
  0xcc   :  { %v266_v42 = vpack.c.bf16 %v250_v36, %v250_v36  ;;  %v510_v47 = vunpack.c.l.bf16 %v494_v38  ;;  %1034 = vtanh.f32 %v472_v39  ;;  %v441_v48 = vmul.f32 0.796875, %v425_v40 }
  0xcd   :  { %v451_v53 = vpack.c.bf16 %v435_v43, %v435_v43  ;;  %v372_v61 = vunpack.c.l.bf16 %v356_v49  ;;  %v209_v1 = vpack.c.bf16 %v174_v51, %v174_v51  ;;  %v416_v3 = vunpack.c.l.bf16 %v400_v54  ;;  %v198_v49 = vpop.f32.mrf.mxu3 }
  0xce   :  { %v282_v45 = vunpack.c.l.bf16 %v266_v42  ;;  %v526_v56 = vadd.f32 1.0, %v510_v47  ;;  %v457_v59 = vpack.c.bf16 %v441_v48, %v441_v48  ;;  %v184_v17 = vadd.f32 %v1156_v16, %v183_v8 }
  0xcf   :  { %v1031_v52 = vpop.eup %1030  ;;  %v467_v2 = vunpack.c.l.bf16 %v451_v53  ;;  %v388_v11 = vadd.f32 %v372_v61, %v1201_v31  ;;  %v1221_v14 = vunpack.c.l.bf16 %v209_v1  ;;  %v432_v15 = vmul.f32 0.796875, %v416_v3 }
  0xd0   :  { %v298_v50 = vmul.f32 %v282_v45, %v1213_v29  ;;  %v498_v0 = vpack.c.bf16 %v1031_v52, %v1031_v52  ;;  %v542_v6 = vpack.c.bf16 %v526_v56, %v526_v56  ;;  %v473_v10 = vunpack.c.l.bf16 %v457_v59 }
  0xd1   :  { %v1033_v57 = vpop.eup %1032  ;;  %1036 = vtanh.f32 %v467_v2  ;;  %v404_v22 = vpack.c.bf16 %v388_v11, %v388_v11  ;;  %v241_v25 = vmul.f32 %v1221_v14, %v1221_v14  ;;  %v448_v26 = vpack.c.bf16 %v432_v15, %v432_v15 }
  0xd2   :  { %v314_v55 = vpack.c.bf16 %v298_v50, %v298_v50  ;;  %v1035_v63 = vpop.eup %1034  ;;  %v495_v7 = vpack.c.bf16 %v1033_v57, %v1033_v57  ;;  %v514_v12 = vunpack.c.l.bf16 %v498_v0  ;;  %v558_v18 = vunpack.c.l.bf16 %v542_v6 }
  0xd3   :  { %v504_v9 = vpack.c.bf16 %v1035_v63, %v1035_v63  ;;  %1038 = vtanh.f32 %v473_v10  ;;  %v213_v27 = vpack.c.bf16 %v184_v17, %v184_v17  ;;  %v420_v36 = vunpack.c.l.bf16 %v404_v22 }
  0xd4   :  { %v330_v62 = vunpack.c.l.bf16 %v314_v55  ;;  %v511_v19 = vunpack.c.l.bf16 %v495_v7  ;;  %v530_v23 = vadd.f32 1.0, %v514_v12  ;;  %v574_v28 = vmul.f32 0.5, %v558_v18  ;;  %v186_v18 = vpop.f32.mrf.mxu2 }
  0xd5   :  { %v520_v21 = vunpack.c.l.bf16 %v504_v9  ;;  %v257_v40 = vpack.c.bf16 %v241_v25, %v241_v25  ;;  %v464_v42 = vunpack.c.l.bf16 %v448_v26  ;;  %v1227_v43 = vunpack.c.l.bf16 %v213_v27  ;;  %v201_v26 = vpop.f32.mrf.mxu3 }
  0xd6   :  { %v346_v5 = vmul.f32 0.044677734, %v330_v62  ;;  %v527_v30 = vadd.f32 1.0, %v511_v19  ;;  %v546_v38 = vpack.c.bf16 %v530_v23, %v530_v23  ;;  %v590_v44 = vpack.c.bf16 %v574_v28, %v574_v28 }
  0xd7   :  { %v1037_v33 = vpop.eup %1036  ;;  %v536_v35 = vadd.f32 1.0, %v520_v21  ;;  %v436_v48 = vmul.f32 0.796875, %v420_v36  ;;  %v273_v53 = vunpack.c.l.bf16 %v257_v40  ;;  %1040 = vtanh.f32 %v464_v42 }
  0xd8   :  { %v362_v13 = vpack.c.bf16 %v346_v5, %v346_v5  ;;  %v543_v45 = vpack.c.bf16 %v527_v30, %v527_v30  ;;  %v499_v46 = vpack.c.bf16 %v1037_v33, %v1037_v33  ;;  %v562_v50 = vunpack.c.l.bf16 %v546_v38 }
  0xd9   :  { %v1039_v41 = vpop.eup %1038  ;;  %v552_v47 = vpack.c.bf16 %v536_v35, %v536_v35  ;;  %v245_v54 = vmul.f32 %v1227_v43, %v1227_v43  ;;  %v606_v55 = vunpack.c.l.bf16 %v590_v44  ;;  %v289_v59 = vmul.f32 %v273_v53, %v1221_v14 }
  0xda   :  { %v378_v24 = vunpack.c.l.bf16 %v362_v13  ;;  %v505_v51 = vpack.c.bf16 %v1039_v41, %v1039_v41  ;;  %v559_v56 = vunpack.c.l.bf16 %v543_v45  ;;  %v515_v57 = vunpack.c.l.bf16 %v499_v46 }
  0xdb   :  { %v568_v61 = vunpack.c.l.bf16 %v552_v47  ;;  %v452_v62 = vpack.c.bf16 %v436_v48, %v436_v48  ;;  %v261_v63 = vpack.c.bf16 %v245_v54, %v245_v54  ;;  %v578_v0 = vmul.f32 0.5, %v562_v50 }
  0xdc   :  { %v394_v39 = vadd.f32 %v378_v24, %v1213_v29  ;;  %v521_v1 = vunpack.c.l.bf16 %v505_v51  ;;  %v305_v3 = vpack.c.bf16 %v289_v59, %v289_v59  ;;  %v199_v6 = vadd.f32 %v1156_v16, %v198_v49 }
  0xdd   :  { %v277_v5 = vunpack.c.l.bf16 %v261_v63  ;;  %v622_v7 = vmul.f32 %v606_v55, %v1159_v20  ;;  %v575_v8 = vmul.f32 0.5, %v559_v56  ;;  %v531_v9 = vadd.f32 1.0, %v515_v57  ;;  %v1041_v11 = vpop.eup %1040 }
  0xde   :  { %v410_v52 = vpack.c.bf16 %v394_v39, %v394_v39  ;;  %v321_v10 = vunpack.c.l.bf16 %v305_v3  ;;  %v584_v12 = vmul.f32 0.5, %v568_v61  ;;  %v468_v13 = vunpack.c.l.bf16 %v452_v62 }
  0xdf   :  { %v293_v15 = vmul.f32 %v277_v5, %v1227_v43  ;;  %v219_v17 = vpack.c.bf16 %v199_v6, %v199_v6  ;;  %v594_v19 = vpack.c.bf16 %v578_v0, %v578_v0  ;;  %v537_v21 = vadd.f32 1.0, %v521_v1  ;;  %v188_v0 = vpop.f32.mrf.mxu2 }
  0xe0   :  { %v426_v2 = vunpack.c.l.bf16 %v410_v52  ;;  %v337_v23 = vmul.f32 0.044677734, %v321_v10  ;;  %v638_v27 = vpack.c.bf16 %v622_v7, %v622_v7  ;;  %v591_v20 = vpack.c.bf16 %v575_v8, %v575_v8 }
  0xe1   :  { %v309_v24 = vpack.c.bf16 %v293_v15, %v293_v15  ;;  %v1235_v25 = vunpack.c.l.bf16 %v219_v17  ;;  %v547_v28 = vpack.c.bf16 %v531_v9, %v531_v9  ;;  %v496_v30 = vpack.c.bf16 %v1041_v11, %v1041_v11  ;;  %v203_v9 = vpop.f32.mrf.mxu3 }
  0xe2   :  { %v442_v22 = vmul.f32 0.796875, %v426_v2  ;;  %1042 = vtanh.f32 %v468_v13  ;;  %v353_v33 = vpack.c.bf16 %v337_v23, %v337_v23  ;;  %v610_v36 = vunpack.c.l.bf16 %v594_v19 }
  0xe3   :  { %v325_v35 = vunpack.c.l.bf16 %v309_v24  ;;  %v600_v38 = vpack.c.bf16 %v584_v12, %v584_v12  ;;  %v553_v39 = vpack.c.bf16 %v537_v21, %v537_v21  ;;  %v251_v44 = vmul.f32 %v1235_v25, %v1235_v25 }
  0xe4   :  { %v458_v40 = vpack.c.bf16 %v442_v22, %v442_v22  ;;  %v369_v41 = vunpack.c.l.bf16 %v353_v33  ;;  %v1239_v45 = vunpack.c.l.bf16 %v638_v27  ;;  %v607_v46 = vunpack.c.l.bf16 %v591_v20 }
  0xe5   :  { %v341_v42 = vmul.f32 0.044677734, %v325_v35  ;;  %v563_v47 = vunpack.c.l.bf16 %v547_v28  ;;  %v512_v48 = vunpack.c.l.bf16 %v496_v30  ;;  %v267_v51 = vpack.c.bf16 %v251_v44, %v251_v44 }
  0xe6   :  { %v385_v49 = vadd.f32 %v369_v41, %v1221_v14  ;;  %v187_v52 = vadd.f32 %v1156_v16, %v186_v18  ;;  %v1244_v53 = vmul.f32 %v610_v36, %v1166_v32  ;;  %v1246_v54 = vunpack.c.l.bf16 %v600_v38 }
  0xe7   :  { %v357_v50 = vpack.c.bf16 %v341_v42, %v341_v42  ;;  %v569_v55 = vunpack.c.l.bf16 %v553_v39  ;;  %v474_v56 = vunpack.c.l.bf16 %v458_v40  ;;  %v283_v62 = vunpack.c.l.bf16 %v267_v51 }
  0xe8   :  { %v1043_v57 = vpop.eup %1042  ;;  %v401_v59 = vpack.c.bf16 %v385_v49, %v385_v49  ;;  %v214_v63 = vpack.c.bf16 %v187_v52, %v187_v52  ;;  %v1249_v1 = vmul.f32 %v607_v46, %v1173_v37  ;;  %v1251_v2 = vmul.f32 0.5, %v563_v47 }
  0xe9   :  { %v373_v61 = vunpack.c.l.bf16 %v357_v50  ;;  %v528_v3 = vadd.f32 1.0, %v512_v48  ;;  %v202_v5 = vadd.f32 %v1156_v16, %v201_v26  ;;  %v299_v7 = vmul.f32 %v283_v62, %v1235_v25 }
  0xea   :  { %v417_v32 = vunpack.c.l.bf16 %v401_v59  ;;  %v1256_v8 = vunpack.c.l.bf16 %v214_v63  ;;  %v500_v10 = vpack.c.bf16 %v1043_v57, %v1043_v57  ;;  %1044 = vtanh.f32 %v474_v56 }
  0xeb   :  { %v389_v6 = vadd.f32 %v373_v61, %v1227_v43  ;;  %v220_v11 = vpack.c.bf16 %v202_v5, %v202_v5  ;;  %v189_v12 = vadd.f32 %v1156_v16, %v188_v0  ;;  %v315_v15 = vpack.c.bf16 %v299_v7, %v299_v7 }
  0xec   :  { %v433_v37 = vmul.f32 0.796875, %v417_v32  ;;  %v246_v17 = vmul.f32 %v1256_v8, %v1256_v8  ;;  %v1261_v18 = vmul.f32 0.5, %v569_v55  ;;  %v204_v22 = vadd.f32 %v1156_v16, %v203_v9 }
  0xed   :  { %v405_v13 = vpack.c.bf16 %v389_v6, %v389_v6  ;;  %v1263_v19 = vunpack.c.l.bf16 %v220_v11  ;;  %v215_v21 = vpack.c.bf16 %v189_v12, %v189_v12  ;;  %v331_v26 = vunpack.c.l.bf16 %v315_v15 }
  0xee   :  { %v449_v23 = vpack.c.bf16 %v433_v37, %v433_v37  ;;  %v262_v27 = vpack.c.bf16 %v246_v17, %v246_v17  ;;  %v544_v20 = vpack.c.bf16 %v528_v3, %v528_v3  ;;  %v221_v33 = vpack.c.bf16 %v204_v22, %v204_v22 }
  0xef   :  { %v421_v24 = vunpack.c.l.bf16 %v405_v13  ;;  %v252_v28 = vmul.f32 %v1263_v19, %v1263_v19  ;;  %v1268_v30 = vunpack.c.l.bf16 %v215_v21  ;;  %v347_v38 = vmul.f32 0.044677734, %v331_v26 }
  0xf0   :  { %v465_v35 = vunpack.c.l.bf16 %v449_v23  ;;  %v278_v39 = vunpack.c.l.bf16 %v262_v27  ;;  %v1045_v40 = vpop.eup %1044  ;;  %v516_v41 = vunpack.c.l.bf16 %v500_v10  ;;  %v1272_v44 = vunpack.c.l.bf16 %v221_v33 }
  0xf1   :  { %v437_v36 = vmul.f32 0.796875, %v421_v24  ;;  %v268_v42 = vpack.c.bf16 %v252_v28, %v252_v28  ;;  %v247_v16 = vmul.f32 %v1268_v30, %v1268_v30  ;;  %v363_v47 = vpack.c.bf16 %v347_v38, %v347_v38 }
  0xf2   :  { %1046 = vtanh.f32 %v465_v35  ;;  %v294_v48 = vmul.f32 %v278_v39, %v1256_v8  ;;  %v560_v49 = vunpack.c.l.bf16 %v544_v20  ;;  %v253_v52 = vmul.f32 %v1272_v44, %v1272_v44 }
  0xf3   :  { %v453_v46 = vpack.c.bf16 %v437_v36, %v437_v36  ;;  %v284_v50 = vunpack.c.l.bf16 %v268_v42  ;;  %v263_v51 = vpack.c.bf16 %v247_v16, %v247_v16  ;;  %v506_v55 = vpack.c.bf16 %v1045_v40, %v1045_v40 }
  0xf4   :  { %v379_v57 = vunpack.c.l.bf16 %v363_v47  ;;  %v310_v59 = vpack.c.bf16 %v294_v48, %v294_v48  ;;  %v595_v61 = vpack.c.bf16 %v1251_v2, %v1251_v2  ;;  %v269_v0 = vpack.c.bf16 %v253_v52, %v253_v52 }
  0xf5   :  { %v469_v56 = vunpack.c.l.bf16 %v453_v46  ;;  %v300_v62 = vmul.f32 %v284_v50, %v1263_v19  ;;  %v279_v63 = vunpack.c.l.bf16 %v263_v51  ;;  %v532_v3 = vadd.f32 1.0, %v516_v41 }
  0xf6   :  { %v395_v5 = vadd.f32 %v379_v57, %v1235_v25  ;;  %v326_v32 = vunpack.c.l.bf16 %v310_v59  ;;  %v601_v6 = vpack.c.bf16 %v1261_v18, %v1261_v18  ;;  %v285_v10 = vunpack.c.l.bf16 %v269_v0 }
  0xf7   :  { %1048 = vtanh.f32 %v469_v56  ;;  %v316_v7 = vpack.c.bf16 %v300_v62, %v300_v62  ;;  %v295_v9 = vmul.f32 %v279_v63, %v1268_v30  ;;  %v576_v12 = vmul.f32 0.5, %v560_v49 }
  0xf8   :  { %v1047_v11 = vpop.eup %1046  ;;  %v522_v37 = vunpack.c.l.bf16 %v506_v55  ;;  %v411_v2 = vpack.c.bf16 %v395_v5, %v395_v5  ;;  %v342_v13 = vmul.f32 0.044677734, %v326_v32  ;;  %v301_v22 = vmul.f32 %v285_v10, %v1272_v44 }
  0xf9   :  { %v497_v15 = vpack.c.bf16 %v1047_v11, %v1047_v11  ;;  %v332_v17 = vunpack.c.l.bf16 %v316_v7  ;;  %v311_v21 = vpack.c.bf16 %v295_v9, %v295_v9  ;;  %v611_v23 = vunpack.c.l.bf16 %v595_v61 }
  0xfa   :  { %v548_v24 = vpack.c.bf16 %v532_v3, %v532_v3  ;;  %v427_v26 = vunpack.c.l.bf16 %v411_v2  ;;  %v358_v27 = vpack.c.bf16 %v342_v13, %v342_v13  ;;  %v317_v33 = vpack.c.bf16 %v301_v22, %v301_v22 }
  0xfb   :  { %v513_v20 = vunpack.c.l.bf16 %v497_v15  ;;  %v348_v18 = vmul.f32 0.044677734, %v332_v17  ;;  %v327_v28 = vunpack.c.l.bf16 %v311_v21  ;;  %v592_v36 = vpack.c.bf16 %v576_v12, %v576_v12 }
  0xfc   :  { %v538_v38 = vadd.f32 1.0, %v522_v37  ;;  %v443_v39 = vmul.f32 0.796875, %v427_v26  ;;  %v374_v40 = vunpack.c.l.bf16 %v358_v27  ;;  %v564_v47 = vunpack.c.l.bf16 %v548_v24 }
  0xfd   :  { %v1049_v35 = vpop.eup %1048  ;;  %v529_v41 = vadd.f32 1.0, %v513_v20  ;;  %v364_v16 = vpack.c.bf16 %v348_v18, %v348_v18  ;;  %v343_v46 = vmul.f32 0.044677734, %v327_v28  ;;  %v333_v50 = vunpack.c.l.bf16 %v317_v33 }
  0xfe   :  { %v501_v42 = vpack.c.bf16 %v1049_v35, %v1049_v35  ;;  %v459_v48 = vpack.c.bf16 %v443_v39, %v443_v39  ;;  %v390_v49 = vadd.f32 %v374_v40, %v1256_v8  ;;  %v554_v57 = vpack.c.bf16 %v538_v38, %v538_v38 }
  0xff   :  { %v545_v51 = vpack.c.bf16 %v529_v41, %v529_v41  ;;  %v380_v55 = vunpack.c.l.bf16 %v364_v16  ;;  %v359_v56 = vpack.c.bf16 %v343_v46, %v343_v46  ;;  %v349_v62 = vmul.f32 0.044677734, %v333_v50 }
 0x100   :  { %v517_v52 = vunpack.c.l.bf16 %v501_v42  ;;  %v475_v59 = vunpack.c.l.bf16 %v459_v48  ;;  %v406_v61 = vpack.c.bf16 %v390_v49, %v390_v49  ;;  %v580_v32 = vmul.f32 0.5, %v564_v47 }
 0x101   :  { %v561_v63 = vunpack.c.l.bf16 %v545_v51  ;;  %v396_v3 = vadd.f32 %v380_v55, %v1263_v19  ;;  %v375_v5 = vunpack.c.l.bf16 %v359_v56  ;;  %v365_v9 = vpack.c.bf16 %v349_v62, %v349_v62 }
 0x102   :  { %v533_v0 = vadd.f32 1.0, %v517_v52  ;;  %1050 = vtanh.f32 %v475_v59  ;;  %v422_v7 = vunpack.c.l.bf16 %v406_v61  ;;  %v617_v2 = vunpack.c.l.bf16 %v601_v6 }
 0x103   :  { %v577_v10 = vmul.f32 0.5, %v561_v63  ;;  %v412_v12 = vpack.c.bf16 %v396_v3, %v396_v3  ;;  %v391_v37 = vadd.f32 %v375_v5, %v1268_v30  ;;  %v570_v13 = vunpack.c.l.bf16 %v554_v57 }
 0x104   :  { %v549_v11 = vpack.c.bf16 %v533_v0, %v533_v0  ;;  %v438_v15 = vmul.f32 0.796875, %v422_v7  ;;  %v381_v17 = vunpack.c.l.bf16 %v365_v9  ;;  %v608_v27 = vunpack.c.l.bf16 %v592_v36 }
 0x105   :  { %v593_v21 = vpack.c.bf16 %v577_v10, %v577_v10  ;;  %v428_v24 = vunpack.c.l.bf16 %v412_v12  ;;  %v407_v26 = vpack.c.bf16 %v391_v37, %v391_v37  ;;  %v596_v20 = vpack.c.bf16 %v580_v32, %v580_v32 }
 0x106   :  { %v565_v22 = vunpack.c.l.bf16 %v549_v11  ;;  %v454_v18 = vpack.c.bf16 %v438_v15, %v438_v15  ;;  %v397_v28 = vadd.f32 %v381_v17, %v1272_v44  ;;  %v627_v41 = vmul.f32 %v611_v23, %v1183_v58  ;;  %v1007_v58 = vld [vmem:[%s1348_s4 + $0x38] sm:$0xff]  ;;  %v1006_v11 = vld [vmem:[%s1348_s4 + $0x30] sm:$0xff] }
 0x107   :  { %v609_v33 = vunpack.c.l.bf16 %v593_v21  ;;  %v444_v38 = vmul.f32 0.796875, %v428_v24  ;;  %v423_v39 = vunpack.c.l.bf16 %v407_v26  ;;  %v586_v6 = vmul.f32 0.5, %v570_v13  ;;  %842 = vmatpush.bf16.msra.mxu1 %v1007_v58 }
 0x108   :  { %v581_v35 = vmul.f32 0.5, %v565_v22  ;;  %v1051_v40 = vpop.eup %1050  ;;  %v470_v42 = vunpack.c.l.bf16 %v454_v18  ;;  %v413_v16 = vpack.c.bf16 %v397_v28, %v397_v28  ;;  %v624_v36 = vmul.f32 %v608_v27, %v1193_v4 }
 0x109   :  { %v625_v46 = vmul.f32 %v609_v33, %v1221_v14  ;;  %v507_v48 = vpack.c.bf16 %v1051_v40, %v1051_v40  ;;  %v460_v49 = vpack.c.bf16 %v444_v38, %v444_v38  ;;  %v439_v50 = vmul.f32 0.796875, %v423_v39 }
 0x10a   :  { %v597_v47 = vpack.c.bf16 %v581_v35, %v581_v35  ;;  %1052 = vtanh.f32 %v470_v42  ;;  %v429_v51 = vunpack.c.l.bf16 %v413_v16  ;;  %v612_v52 = vunpack.c.l.bf16 %v596_v20 }
 0x10b   :  { %v523_v56 = vunpack.c.l.bf16 %v507_v48  ;;  %v476_v57 = vunpack.c.l.bf16 %v460_v49  ;;  %v639_v23 = vpack.c.bf16 %v1249_v1, %v1249_v1  ;;  %v602_v14 = vpack.c.bf16 %v586_v6, %v586_v6  ;;  %843 = vmatpush.bf16.msra.mxu1 %v1006_v11 }
 0x10c   :  { %v613_v55 = vunpack.c.l.bf16 %v597_v47  ;;  %v455_v59 = vpack.c.bf16 %v439_v50, %v439_v50  ;;  %v445_v61 = vmul.f32 0.796875, %v429_v51  ;;  %v641_v62 = vpack.c.bf16 %v625_v46, %v625_v46 }
 0x10d   :  { %v539_v63 = vadd.f32 1.0, %v523_v56  ;;  %1054 = vtanh.f32 %v476_v57  ;;  %v643_v0 = vpack.c.bf16 %v627_v41, %v627_v41  ;;  %v633_v3 = vmul.f32 %v617_v2, %v1186_v60  ;;  %v1004_v41 = vld [vmem:[%s1348_s4 + $0x20] sm:$0xff] }
 0x10e   :  { %v629_v4 = vmul.f32 %v613_v55, %v1227_v43  ;;  %v471_v5 = vunpack.c.l.bf16 %v455_v59  ;;  %v461_v32 = vpack.c.bf16 %v445_v61, %v445_v61  ;;  %v632_v7 = vmul.f32 %v1246_v54, %v1168_v34 }
 0x10f   :  { %v640_v9 = vpack.c.bf16 %v624_v36, %v624_v36  ;;  %v628_v1 = vmul.f32 %v612_v52, %v1201_v31  ;;  %v555_v10 = vpack.c.bf16 %v539_v63, %v539_v63  ;;  %v642_v12 = vpack.c.bf16 %v1244_v53, %v1244_v53  ;;  %v1005_v53 = vld [vmem:[%s1348_s4 + $0x28] sm:$0xff] }
 0x110   :  { %v1053_v43 = vpop.eup %1052  ;;  %v618_v37 = vunpack.c.l.bf16 %v602_v14  ;;  %1056 = vtanh.f32 %v471_v5  ;;  %v477_v60 = vunpack.c.l.bf16 %v461_v32  ;;  %v657_v2 = vunpack.c.l.bf16 %v641_v62  ;;  %844 = vmatpush.bf16.msra.mxu1 %v1005_v53 }
 0x111   :  { %v645_v13 = vpack.c.bf16 %v629_v4, %v629_v4  ;;  %v571_v15 = vunpack.c.l.bf16 %v555_v10  ;;  %v502_v17 = vpack.c.bf16 %v1053_v43, %v1053_v43  ;;  %v655_v34 = vunpack.c.l.bf16 %v639_v23  ;;  %v1002_v43 = vld [vmem:[%s1348_s4 + $0x10] sm:$0xff] }
 0x112   :  { %v659_v54 = vunpack.c.l.bf16 %v643_v0  ;;  %v649_v31 = vpack.c.bf16 %v633_v3, %v633_v3  ;;  %1058 = vtanh.f32 %v477_v60  ;;  %v656_v22 = vunpack.c.l.bf16 %v640_v9 }
 0x113   :  { %v1055_v21 = vpop.eup %1054  ;;  %v644_v24 = vpack.c.bf16 %v628_v1, %v628_v1  ;;  %v587_v26 = vmul.f32 0.5, %v571_v15  ;;  %v518_v27 = vunpack.c.l.bf16 %v502_v17  ;;  %v658_v20 = vunpack.c.l.bf16 %v642_v12 }
 0x114   :  { %v648_v18 = vpack.c.bf16 %v632_v7, %v632_v7  ;;  %v634_v28 = vmul.f32 %v618_v37, %v1213_v29  ;;  %v508_v33 = vpack.c.bf16 %v1055_v21, %v1055_v21  ;;  %v677_v35 = vadd.f32 %v657_v2, %v656_v22  ;;  %845 = vmatpush.bf16.msra.mxu1 %v1004_v41 }
 0x115   :  { %v661_v38 = vunpack.c.l.bf16 %v645_v13  ;;  %v603_v39 = vpack.c.bf16 %v587_v26, %v587_v26  ;;  %v534_v40 = vadd.f32 1.0, %v518_v27  ;;  %v670_v42 = vadd.f32 %v655_v34, %v1239_v45  ;;  %v1003_v45 = vld [vmem:[%s1348_s4 + $0x18] sm:$0xff]  ;;  %v1001_v26 = vld [vmem:[%s1348_s4 + $0x8] sm:$0xff] }
 0x116   :  { %v1057_v6 = vpop.eup %1056  ;;  %v665_v16 = vunpack.c.l.bf16 %v649_v31  ;;  %v524_v46 = vunpack.c.l.bf16 %v508_v33  ;;  %v684_v47 = vadd.f32 %v659_v54, %v658_v20  ;;  %v660_v48 = vunpack.c.l.bf16 %v644_v24 }
 0x117   :  { %v619_v49 = vunpack.c.l.bf16 %v603_v39  ;;  %v550_v36 = vpack.c.bf16 %v534_v40, %v534_v40  ;;  %v664_v50 = vunpack.c.l.bf16 %v648_v18  ;;  %v650_v51 = vpack.c.bf16 %v634_v28, %v634_v28 }
 0x118   :  { %v1059_v29 = vpop.eup %1058  ;;  %v540_v52 = vadd.f32 1.0, %v524_v46  ;;  %v503_v55 = vpack.c.bf16 %v1057_v6, %v1057_v6  ;;  %v678_v56 = vrot.slane %v677_v35, 4  ;;  %v691_v57 = vadd.f32 %v661_v38, %v660_v48  ;;  %846 = vmatpush.bf16.msra.mxu1 %v1003_v45 }
 0x119   :  { %v635_v58 = vmul.f32 %v619_v49, %v1235_v25  ;;  %v566_v23 = vunpack.c.l.bf16 %v550_v36  ;;  %v671_v14 = vrot.slane %v670_v42, 4  ;;  %v509_v62 = vpack.c.bf16 %v1059_v29, %v1059_v29 }
 0x11a   :  { %v556_v59 = vpack.c.bf16 %v540_v52, %v540_v52  ;;  %v519_v61 = vunpack.c.l.bf16 %v503_v55  ;;  %v685_v4 = vrot.slane %v684_v47, 4  ;;  %v705_v63 = vadd.f32 %v665_v16, %v664_v50 }
 0x11b   :  { %v651_v0 = vpack.c.bf16 %v635_v58, %v635_v58  ;;  %v582_v3 = vmul.f32 0.5, %v566_v23  ;;  %v666_v5 = vunpack.c.l.bf16 %v650_v51  ;;  %v525_v9 = vunpack.c.l.bf16 %v509_v62 }
 0x11c   :  { %v572_v32 = vunpack.c.l.bf16 %v556_v59  ;;  %v535_v7 = vadd.f32 1.0, %v519_v61  ;;  %v679_v1 = vadd.f32 %v678_v56, %v677_v35  ;;  %v692_v25 = vrot.slane %v691_v57, 4  ;;  %847 = vmatpush.bf16.msra.mxu1 %v1002_v43 }
 0x11d   :  { %v667_v10 = vunpack.c.l.bf16 %v651_v0  ;;  %v598_v11 = vpack.c.bf16 %v582_v3, %v582_v3  ;;  %v541_v60 = vadd.f32 1.0, %v525_v9  ;;  %v672_v2 = vadd.f32 %v671_v14, %v670_v42  ;;  %v1000_v42 = vld [vmem:[%s1348_s4] sm:$0xff] }
 0x11e   :  { %v588_v12 = vmul.f32 0.5, %v572_v32  ;;  %v551_v37 = vpack.c.bf16 %v535_v7, %v535_v7  ;;  %v706_v13 = vrot.slane %v705_v63, 4  ;;  %v686_v21 = vadd.f32 %v685_v4, %v684_v47 }
 0x11f   :  { %v712_v15 = vadd.f32 %v667_v10, %v666_v5  ;;  %v614_v17 = vunpack.c.l.bf16 %v598_v11  ;;  %v557_v31 = vpack.c.bf16 %v541_v60, %v541_v60  ;;  %v680_v22 = vrot.slane %v679_v1, 2 }
 0x120   :  { %v604_v34 = vpack.c.bf16 %v588_v12, %v588_v12  ;;  %v567_v54 = vunpack.c.l.bf16 %v551_v37  ;;  %v693_v24 = vadd.f32 %v692_v25, %v691_v57  ;;  %v673_v28 = vrot.slane %v672_v2, 2  ;;  %848 = vmatpush.bf16.msra.mxu1 %v1001_v26 }
 0x121   :  { %v713_v27 = vrot.slane %v712_v15, 4  ;;  %v573_v18 = vunpack.c.l.bf16 %v557_v31  ;;  %v707_v33 = vadd.f32 %v706_v13, %v705_v63  ;;  %v630_v35 = vmul.f32 %v614_v17, %v1256_v8 }
 0x122   :  { %v620_v53 = vunpack.c.l.bf16 %v604_v34  ;;  %v583_v20 = vmul.f32 0.5, %v567_v54  ;;  %v687_v40 = vrot.slane %v686_v21, 2  ;;  %v681_v41 = vadd.f32 %v680_v22, %v679_v1 }
 0x123   :  { %v589_v39 = vmul.f32 0.5, %v573_v18  ;;  %v694_v6 = vrot.slane %v693_v24, 2  ;;  %v714_v48 = vadd.f32 %v713_v27, %v712_v15  ;;  %v674_v49 = vadd.f32 %v673_v28, %v672_v2 }
 0x124   :  { %v599_v38 = vpack.c.bf16 %v583_v20, %v583_v20  ;;  %v636_v16 = vmul.f32 %v620_v53, %v1263_v19  ;;  %v646_v36 = vpack.c.bf16 %v630_v35, %v630_v35  ;;  %v708_v50 = vrot.slane %v707_v33, 2  ;;  %849 = vmatpush.bf16.msra.mxu1 %v1000_v42 }
 0x125   :  { %v605_v47 = vpack.c.bf16 %v589_v39, %v589_v39  ;;  %v688_v51 = vadd.f32 %v687_v40, %v686_v21  ;;  %v682_v52 = vrot.slane %v681_v41, 1  ;;  %v695_v55 = vadd.f32 %v694_v6, %v693_v24 }
 0x126   :  { %v615_v46 = vunpack.c.l.bf16 %v599_v38  ;;  %v652_v56 = vpack.c.bf16 %v636_v16, %v636_v16  ;;  %v715_v23 = vrot.slane %v714_v48, 2  ;;  %v675_v45 = vrot.slane %v674_v49, 1 }
 0x127   :  { %v621_v8 = vunpack.c.l.bf16 %v605_v47  ;;  %v662_v19 = vunpack.c.l.bf16 %v646_v36  ;;  %v709_v61 = vadd.f32 %v708_v50, %v707_v33  ;;  %v689_v62 = vrot.slane %v688_v51, 1 }
 0x128   :  { %v631_v29 = vmul.f32 %v615_v46, %v1268_v30  ;;  %v683_v4 = vadd.f32 %v682_v52, %v681_v41  ;;  %v696_v63 = vrot.slane %v695_v55, 1  ;;  %v668_v30 = vunpack.c.l.bf16 %v652_v56 }
 0x129   :  { %v637_v58 = vmul.f32 %v621_v8, %v1272_v44  ;;  %v716_v5 = vadd.f32 %v715_v23, %v714_v48  ;;  %v676_v32 = vadd.f32 %v675_v45, %v674_v49  ;;  %v710_v1 = vrot.slane %v709_v61, 1 }
 0x12a   :  { %v647_v57 = vpack.c.bf16 %v631_v29, %v631_v29  ;;  %v690_v25 = vadd.f32 %v689_v62, %v688_v51  ;;  %v727_v10 = vmul.f32 0.0625, %v683_v4  ;;  %v697_v44 = vadd.f32 %v696_v63, %v695_v55 }
 0x12b   :  { %v653_v59 = vpack.c.bf16 %v637_v58, %v637_v58  ;;  %v717_v43 = vrot.slane %v716_v5, 1  ;;  %v726_v37 = vmul.f32 0.0625, %v676_v32  ;;  %v711_v2 = vadd.f32 %v710_v1, %v709_v61 }
 0x12c   :  { %v663_v14 = vunpack.c.l.bf16 %v647_v57  ;;  %v735_v15 = vpack.c.bf16 %v727_v10, %v727_v10  ;;  %v728_v17 = vmul.f32 0.0625, %v690_v25  ;;  %v729_v34 = vmul.f32 0.0625, %v697_v44 }
 0x12d   :  { %v669_v3 = vunpack.c.l.bf16 %v653_v59  ;;  %v718_v31 = vadd.f32 %v717_v43, %v716_v5  ;;  %v734_v22 = vpack.c.bf16 %v726_v37, %v726_v37  ;;  %v731_v27 = vmul.f32 0.0625, %v711_v2  ;;  %v1027_v59 = vld [vmem:[%s1347_s5] ss:$0 sm:$0xff] }
 0x12e   :  { %v698_v0 = vadd.f32 %v663_v14, %v662_v19  ;;  %v736_v53 = vpack.c.bf16 %v728_v17, %v728_v17  ;;  %v737_v20 = vpack.c.bf16 %v729_v34, %v729_v34  ;;  %v771_v18 = vunpack.c.l.b16 %v735_v15 }
 0x12f   :  { %v719_v9 = vadd.f32 %v669_v3, %v668_v30  ;;  %v732_v35 = vmul.f32 0.0625, %v718_v31  ;;  %v770_v38 = vunpack.c.l.b16 %v734_v22  ;;  %v739_v41 = vpack.c.bf16 %v731_v27, %v731_v27  ;;  %v870_v30 = vld [vmem:[%s1350_s1] sm:$0xff] }
 0x130   :  { %v699_v7 = vrot.slane %v698_v0, 4  ;;  %v772_v6 = vunpack.c.l.b16 %v736_v53  ;;  %v773_v42 = vunpack.c.l.b16 %v737_v20  ;;  %v1064_v45 = vmov 0  }
 0x131   :  { %v720_v12 = vrot.slane %v719_v9, 4  ;;  %v779_v16 = vsel %vm778_vm0, %v771_v18, %v770_v38  ;;  %v740_v48 = vpack.c.bf16 %v732_v35, %v732_v35  ;;  %v775_v8 = vunpack.c.l.b16 %v739_v41  ;;  %1025 = vset.pattern.permute.xlu0 %v1064_v45 }
 0x132   :  { %v700_v11 = vadd.f32 %v699_v7, %v698_v0  ;;  %v781_v29 = vsel %vm780_vm1, %v772_v6, %v779_v16  ;;  %v856_v19 = vlaneseq }
 0x133   :  { %v721_v13 = vadd.f32 %v720_v12, %v719_v9  ;;  %v783_v50 = vsel %vm782_vm2, %v773_v42, %v781_v29  ;;  %v776_v51 = vunpack.c.l.b16 %v740_v48 }
 0x134   :  { %v701_v60 = vrot.slane %v700_v11, 2  ;;  %v857_v14 = vand.u32 127, %v856_v19 }
 0x135   :  { %v722_v21 = vrot.slane %v721_v13, 2 }
 0x136   :  { %v702_v54 = vadd.f32 %v701_v60, %v700_v11  ;;  %vm858_vm7 = vcmp.lt.s32.totalorder %v857_v14, 10 }
 0x137   :  { %v723_v26 = vadd.f32 %v722_v21, %v721_v13 }
 0x138   :  { %v703_v24 = vrot.slane %v702_v54, 1 }
 0x139   :  { %v724_v33 = vrot.slane %v723_v26, 1 }
 0x13a   :  { %v704_v28 = vadd.f32 %v703_v24, %v702_v54 }
 0x13b   :  { %v725_v39 = vadd.f32 %v724_v33, %v723_v26 }
 0x13c   :  { %v730_v40 = vmul.f32 0.0625, %v704_v28 }
 0x13d   :  { %v733_v46 = vmul.f32 0.0625, %v725_v39 }
 0x13e   :  { %v738_v47 = vpack.c.bf16 %v730_v40, %v730_v40 }
 0x13f   :  { %v741_v49 = vpack.c.bf16 %v733_v46, %v733_v46 }
 0x140   :  { %v774_v36 = vunpack.c.l.b16 %v738_v47 }
 0x141   :  { %v777_v55 = vunpack.c.l.b16 %v741_v49 }
 0x142   :  { %v785_v52 = vsel %vm784_vm3, %v774_v36, %v783_v50 }
 0x143   :  { %v787_v56 = vsel %vm786_vm4, %v775_v8, %v785_v52 }
 0x144   :  { %v789_v57 = vsel %vm788_vm5, %v776_v51, %v787_v56 }
 0x145   :  { %v791_v58 = vsel %vm790_vm6, %v777_v55, %v789_v57 }
 0x146   :  { %v792_v23 = vpack.c.b16 %v791_v58, %v791_v58 }
 0x148   :  { %850 = vmatmul.bf16.vlgmr.msra.gmra.mxu1 %v792_v23 }
 0x1c5   :  { %v851_v61 = vpop.f32.mrf.mxu1 }
 0x1c6   :  { %v852_v62 = vadd.f32 %v1027_v59, %v851_v61 }
 0x1c8   :  { %855 = vst [vmem:[%s1349_s6] sm:$0xff] %v852_v62  ;;  %v859_v4 = vsel %vm858_vm7, %v852_v62, -1e+30 }
 0x1c9   :  { %860 = vmax.xlane.f32.xlu0 %v859_v4 }
 0x1cd   :  { %v853_v63 = vpop.f32.mrf.mxu1 }
 0x1dd   :  { %872 = vperm.xlu0 %1025, %v870_v30  }
 0x23c   :  { %v861_v0 = vpop.xlane.xlu0 %860 }
 0x23d   :  { %v862_v3 = vsub.f32 %v859_v4, %v861_v0 }
 0x23f   :  { %v863_v5 = vmul.f32 1.442695, %v862_v3 }
 0x241   :  { %1060 = vpow2.f32 %v863_v5 }
 0x247   :  { %v1061_v32 = vpop.eup %1060 }
 0x248   :  { %865 = vadd.xlane.f32.xlu1 %v1061_v32 }
 0x24f   :  { %v873_v7 = vpop.permute.xlu0 %872 }
 0x250   :  { %vm874_vm8 = vcmp.eq.s32.totalorder %v857_v14, %v873_v7 }
 0x251   :  { %v875_v9 = vsel %vm874_vm8, %v852_v62, 0.0 }
 0x252   :  { %876 = vadd.xlane.f32.xlu1 %v875_v9 }
 0x2bb   :  { %v866_v1 = vpop.xlane.xlu1 %865 }
 0x2bc   :  { %1062 = vlog2.f32 %v866_v1 }
 0x2c2   :  { %v1063_v25 = vpop.eup %1062 }
 0x2c3   :  { %v868_v10 = vmul.f32 0.6931472, %v1063_v25 }
 0x2c5   :  { %v869_v44 = vadd.f32 %v868_v10, %v861_v0  ;;  %v877_v11 = vpop.xlane.xlu1 %876 }
 0x2c7   :  { %v878_v43 = vsub.f32 %v869_v44, %v877_v11 }
 0x2c9   :  { %879 = vst [vmem:[%s1351_s7] sm:$0xff] %v878_v43 }

</bundles_post_ra>
